<compile_context>
chip_gen: v7x
topology: tpu7x:2x2x1
jax: 0.10.0
libtpu: 0.0.40
codegen_flags: <defaults>
</compile_context>

<pallas_src>
import functools

import numpy as np
import jax
import jax.numpy as jnp
from jax.experimental import pallas as pl
from jax.experimental.pallas import tpu as pltpu

K_CHEB = 4  # GConvGRU(node_features, hidden, K=4)


def _cheb_basis(l_hat, x):
    """Concatenated Chebyshev basis [T0 x | T1 x | ... | T_{K-1} x] -> (N, K*F).

    T0 = x, T1 = L_hat @ x, T_k = 2 * L_hat @ T_{k-1} - T_{k-2}.
    Chebyshev propagation is column-wise linear, so applying it to [X | H]
    yields [T_k X | T_k H] in place — this is what lets the X and H bases fuse.
    """
    t0 = x
    t1 = jnp.dot(l_hat, t0, preferred_element_type=jnp.float32)
    ts = [t0, t1]
    for _ in range(2, K_CHEB):
        ts.append(2.0 * jnp.dot(l_hat, ts[-1], preferred_element_type=jnp.float32) - ts[-2])
    return jnp.concatenate(ts, axis=-1)


# ----------------------------------------------------------------------------
# Kernel A: H == 0 specialization (what OURGRU.forward actually executes).
# With H=0: conv_h_z(H)=b_hz, conv_h_r(H)=b_hr, conv_h_h(H*R)=b_hh (biases are
# folded into bgate), R drops out entirely, and H_new = (1-Z)*H_tilde.
# Only the z|h gate columns are packed -> 3 L-matmuls + 1 (K*F, 2*Hd) matmul.
# ----------------------------------------------------------------------------
def ourgru_h0_kernel(l_ref, x_ref, wg_ref, bg_ref, wlin_ref, blin_ref, o_ref):
    hidden = bg_ref.shape[-1] // 2
    L = l_ref[...]
    TX = _cheb_basis(L, x_ref[...])                                            # (N, K*F)
    GP = jnp.dot(TX, wg_ref[...], preferred_element_type=jnp.float32) + bg_ref[...]  # (N, 2*Hd)

    Z = jax.nn.sigmoid(GP[:, :hidden])
    H_tilde = jnp.tanh(GP[:, hidden:])
    H_new = (1.0 - Z) * H_tilde                                                # Z*H == 0

    # Dropout(p=0.25) eval mode == identity.
    # Linear(hidden, 1) as VPU multiply + lane reduction (no width-1 MXU matmul).
    o_ref[...] = jnp.sum(H_new * wlin_ref[...], axis=-1, keepdims=True) + blin_ref[...]


# ----------------------------------------------------------------------------
# Kernel B: general hidden state (recurrent use).  Fused X|H basis + single
# gate matmul; only the candidate-state propagation of H*R needs its own basis.
# Total: 6 L-matmuls + 2 weight matmuls (was 9 + 3).
# ----------------------------------------------------------------------------
def ourgru_kernel(l_ref, x_ref, h_ref, wg_ref, bg_ref, whh_ref, wlin_ref, blin_ref, o_ref):
    hidden = h_ref.shape[-1]
    L = l_ref[...]
    X = x_ref[...]
    H = h_ref[...]

    # One fused Chebyshev pass over [X | H]  (3 L-matmuls, wide RHS).
    T = _cheb_basis(L, jnp.concatenate([X, H], axis=-1))                       # (N, K*(F+Hd))

    # All gate pre-activations (z | r | h-candidate X-side) in ONE matmul.
    GP = jnp.dot(T, wg_ref[...], preferred_element_type=jnp.float32) + bg_ref[...]   # (N, 3*Hd)

    Z = jax.nn.sigmoid(GP[:, :hidden])
    R = jax.nn.sigmoid(GP[:, hidden:2 * hidden])

    # Candidate state propagates H * R -> needs its own basis (3 more L-matmuls).
    THR = _cheb_basis(L, H * R)                                                # (N, K*Hd)
    H_tilde = jnp.tanh(
        GP[:, 2 * hidden:]
        + jnp.dot(THR, whh_ref[...], preferred_element_type=jnp.float32))
    H_new = Z * H + (1.0 - Z) * H_tilde

    o_ref[...] = jnp.sum(H_new * wlin_ref[...], axis=-1, keepdims=True) + blin_ref[...]


# ----------------------------------------------------------------------------
# Graph normalization (plain-JAX glue, outside the kernel).
# ----------------------------------------------------------------------------
def scaled_laplacian(edge_index, edge_weight, num_nodes):
    """Dense L_hat matching PyG ChebConv.__norm__ (sym norm, lambda_max=2.0):
       L_hat[i, j] = -deg^{-1/2}[j] * w_ij * deg^{-1/2}[i] for edge j->i, zero diagonal."""
    src, dst = edge_index[0], edge_index[1]
    if edge_weight is None:
        edge_weight = jnp.ones(src.shape[0], jnp.float32)
    keep = (src != dst).astype(jnp.float32)          # remove self loops
    w = edge_weight.astype(jnp.float32) * keep
    deg = jnp.zeros((num_nodes,), jnp.float32).at[src].add(w)
    dis = jnp.where(deg > 0, jax.lax.rsqrt(jnp.maximum(deg, 1e-12)), 0.0)
    vals = -dis[src] * w * dis[dst]
    return jnp.zeros((num_nodes, num_nodes), jnp.float32).at[dst, src].add(vals)


def init_params(key, node_features, hidden):
    """Deterministic synthetic parameters (GConvGRU's six ChebConvs + Linear)."""
    ks = jax.random.split(key, 14)
    params = {}
    names = ["xz", "hz", "xr", "hr", "xh", "hh"]
    for i, name in enumerate(names):
        fin = node_features if name[0] == "x" else hidden
        params["w" + name] = 0.1 * jax.random.normal(ks[2 * i], (K_CHEB, fin, hidden), jnp.float32)
        params["b" + name] = 0.1 * jax.random.normal(ks[2 * i + 1], (1, hidden), jnp.float32)
    params["wlin"] = 0.1 * jax.random.normal(ks[12], (hidden, 1), jnp.float32)
    params["blin"] = 0.1 * jax.random.normal(ks[13], (1, 1), jnp.float32)
    return params


# ----------------------------------------------------------------------------
# Wrapper-side weight packing.
# ----------------------------------------------------------------------------
def _flat(w):  # (K, Fin, Hd) -> (K*Fin, Hd); k-major rows match concat([T0 x, T1 x, ...], -1)
    return w.reshape(K_CHEB * w.shape[1], w.shape[2])


def _pack_params_h0(params):
    """H==0 path: only the z and h-candidate X-side columns are ever used."""
    wg = jnp.concatenate([_flat(params["wxz"]), _flat(params["wxh"])], axis=-1)        # (K*F, 2*Hd)
    bg = jnp.concatenate([params["bxz"] + params["bhz"],
                          params["bxh"] + params["bhh"]], axis=-1)                     # (1, 2*Hd)
    return wg, bg, params["wlin"].reshape(1, -1), params["blin"].reshape(1, 1)


def _pack_params_general(params, hidden):
    """Fused gate weight matching the [T_k X | T_k H] basis layout:
       per-k row block = [[WXz[k] WXr[k] WXh[k]], [WHz[k] WHr[k] 0]]."""
    blocks = []
    for k in range(K_CHEB):
        xrows = jnp.concatenate([params["wxz"][k], params["wxr"][k], params["wxh"][k]], axis=-1)
        hrows = jnp.concatenate([params["whz"][k], params["whr"][k],
                                 jnp.zeros((hidden, hidden), jnp.float32)], axis=-1)
        blocks.append(jnp.concatenate([xrows, hrows], axis=0))                 # (F+Hd, 3*Hd)
    wgate = jnp.concatenate(blocks, axis=0)                                    # (K*(F+Hd), 3*Hd)
    bgate = jnp.concatenate([params["bxz"] + params["bhz"],
                             params["bxr"] + params["bhr"],
                             params["bxh"] + params["bhh"]], axis=-1)          # (1, 3*Hd)
    whh = _flat(params["whh"])                                                 # (K*Hd, Hd)
    return wgate, bgate, whh, params["wlin"].reshape(1, -1), params["blin"].reshape(1, 1)


def _vmem_limit_bytes(arrays, num_nodes, hidden):
    """Explicit scoped-VMEM request: operands + Chebyshev-basis working set, clamped."""
    operand = sum(int(np.prod(a.shape)) * a.dtype.itemsize for a in arrays)
    working = 4 * num_nodes * (K_CHEB + 4) * (hidden + 8) * 4   # generous basis/temps estimate
    return int(min(max(2 * operand + working + (4 << 20), 16 << 20), 48 << 20))


@functools.partial(jax.jit, static_argnames=("num_nodes",))
def ourgru_forward(x, edge_index, edge_weight, params, num_nodes, h=None):
    L = scaled_laplacian(edge_index, edge_weight, num_nodes)
    hidden = params["whz"].shape[-1]
    x = x.astype(jnp.float32)
    vmem = pl.BlockSpec(memory_space=pltpu.MemorySpace.VMEM)

    if h is None:
        # GConvGRU._set_hidden_state(H=None) -> zeros: use the specialized kernel and
        # skip the (dead) H-side entirely (6 of 9 L passes + 2 weight matmuls removed).
        wg, bg, wlin, blin = _pack_params_h0(params)
        inputs = [L, x, wg, bg, wlin, blin]
        kernel = ourgru_h0_kernel
    else:
        wgate, bgate, whh, wlin, blin = _pack_params_general(params, hidden)
        inputs = [L, x, h.astype(jnp.float32), wgate, bgate, whh, wlin, blin]
        kernel = ourgru_kernel

    # NOTE: at these shapes everything (incl. dense L) trivially fits VMEM, so a
    # single grid-less call is used; see TODOs at top for the row-tiled large-N path.
    return pl.pallas_call(
        kernel,
        out_shape=jax.ShapeDtypeStruct((num_nodes, 1), jnp.float32),
        in_specs=[vmem] * len(inputs),
        out_specs=vmem,
        compiler_params=pltpu.CompilerParams(
            vmem_limit_bytes=_vmem_limit_bytes(inputs, num_nodes, hidden)),
    )(*inputs)


# ----------------------------------------------------------------------------
# Pure-numpy float64 reference of the original module math (for validation).
# ----------------------------------------------------------------------------
def _reference_forward(x, L, params, h):
    def cheb(op, w, b):
        w = np.asarray(w, np.float64)
        b = np.asarray(b, np.float64)
        t_prev, t = op, L @ op
        out = t_prev @ w[0] + t @ w[1]
        for k in range(2, K_CHEB):
            t_prev, t = t, 2.0 * (L @ t) - t_prev
            out = out + t @ w[k]
        return out + b

    sig = lambda v: 1.0 / (1.0 + np.exp(-v))
    Z = sig(cheb(x, params["wxz"], params["bxz"]) + cheb(h, params["whz"], params["bhz"]))
    R = sig(cheb(x, params["wxr"], params["bxr"]) + cheb(h, params["whr"], params["bhr"]))
    Ht = np.tanh(cheb(x, params["wxh"], params["bxh"]) + cheb(h * R, params["whh"], params["bhh"]))
    Hn = Z * h + (1.0 - Z) * Ht
    return Hn @ np.asarray(params["wlin"], np.float64) + np.asarray(params["blin"], np.float64)


if __name__ == "__main__":
    N, F, H = 16, 4, 32   # num_nodes, node_features, hidden_layer_size
    key = jax.random.PRNGKey(0)
    kx, kp, kh = jax.random.split(key, 3)

    x = jax.random.normal(kx, (N, F), jnp.float32)

    # bidirectional ring graph
    idx = jnp.arange(N)
    src = jnp.concatenate([idx, (idx + 1) % N])
    dst = jnp.concatenate([(idx + 1) % N, idx])
    edge_index = jnp.stack([src, dst]).astype(jnp.int32)   # [2, E]
    edge_weight = jnp.ones((src.shape[0],), jnp.float32)   # [E]

    params = init_params(kp, F, H)

    # 1) Module-faithful path (GConvGRU called with H=None -> zeros): specialized kernel.
    out = ourgru_forward(x, edge_index, edge_weight, params, N)
    jax.block_until_ready(out)
    assert out.shape == (N, 1) and out.dtype == jnp.float32

    # 2) General recurrent path (explicit hidden state): fused X|H basis + single gate matmul.
    h_prev = 0.5 * jax.random.normal(kh, (N, H), jnp.float32)
    out_h = ourgru_forward(x, edge_index, edge_weight, params, N, h=h_prev)
    jax.block_until_ready(out_h)

    # Validate both paths against a float64 reference of the original module math.
    L_np = np.asarray(scaled_laplacian(edge_index, edge_weight, N), np.float64)
    x_np = np.asarray(x, np.float64)
    ref0 = _reference_forward(x_np, L_np, params, np.zeros((N, H), np.float64))
    refh = _reference_forward(x_np, L_np, params, np.asarray(h_prev, np.float64))
    assert np.allclose(np.asarray(out), ref0, rtol=5e-3, atol=5e-4)
    assert np.allclose(np.asarray(out_h), refh, rtol=5e-3, atol=5e-4)

    print("KERNEL_OK")
</pallas_src>

<mosaic_0001>
module attributes {stable_mosaic.version = 11 : i64} {
  func.func private @main(%arg0: i32) attributes {dimension_semantics = [#tpu.dimension_semantics<core_parallel>], iteration_bounds = array<i64: 2>, tpu.core_type = #tpu.core_type<sc_scalar_subcore>, window_params = []} {
    return
  }
}

module attributes {stable_mosaic.version = 11 : i64} {
  func.func private @main(%arg0: i32) attributes {dimension_semantics = [#tpu.dimension_semantics<core_parallel>], iteration_bounds = array<i64: 2>, tpu.core_type = #tpu.core_type<sc_scalar_subcore>, window_params = []} {
    return
  }
}

module attributes {stable_mosaic.version = 11 : i64} {
  func.func @ourgru_h0_kernel(%arg0: memref<16x16xf32, #tpu.memory_space<vmem>>, %arg1: memref<16x4xf32, #tpu.memory_space<vmem>>, %arg2: memref<16x64xf32, #tpu.memory_space<vmem>>, %arg3: memref<1x64xf32, #tpu.memory_space<vmem>>, %arg4: memref<1x32xf32, #tpu.memory_space<vmem>>, %arg5: memref<1x1xf32, #tpu.memory_space<vmem>>, %arg6: memref<16x1xf32, #tpu.memory_space<vmem>>) attributes {dimension_semantics = [], scalar_prefetch = 0 : i64, scratch_operands = 0 : i64, tpu.core_type = #tpu.core_type<tc>} {
    %c0 = arith.constant 0 : index
    %c0_0 = arith.constant 0 : index
    %0 = vector.load %arg0[%c0, %c0_0] : memref<16x16xf32, #tpu.memory_space<vmem>>, vector<16x16xf32>
    %c0_1 = arith.constant 0 : index
    %c0_2 = arith.constant 0 : index
    %1 = vector.load %arg1[%c0_1, %c0_2] : memref<16x4xf32, #tpu.memory_space<vmem>>, vector<16x4xf32>
    %cst = arith.constant dense<0.000000e+00> : vector<16x4xf32>
    %2 = tpu.matmul %0, %1, %cst {dimension_numbers = #tpu.dot_dimension_numbers<[1], [0], [0], [1], [0, 0, 1, 1], [], []>} : vector<16x16xf32>, vector<16x4xf32>, vector<16x4xf32> -> vector<16x4xf32>
    %cst_3 = arith.constant dense<0.000000e+00> : vector<16x4xf32>
    %3 = tpu.matmul %0, %2, %cst_3 {dimension_numbers = #tpu.dot_dimension_numbers<[1], [0], [0], [1], [0, 0, 1, 1], [], []>} : vector<16x16xf32>, vector<16x4xf32>, vector<16x4xf32> -> vector<16x4xf32>
    %cst_4 = arith.constant 2.000000e+00 : f32
    %4 = vector.broadcast %cst_4 : f32 to vector<16x4xf32>
    %5 = arith.mulf %4, %3 : vector<16x4xf32>
    %6 = arith.subf %5, %1 : vector<16x4xf32>
    %cst_5 = arith.constant dense<0.000000e+00> : vector<16x4xf32>
    %7 = tpu.matmul %0, %6, %cst_5 {dimension_numbers = #tpu.dot_dimension_numbers<[1], [0], [0], [1], [0, 0, 1, 1], [], []>} : vector<16x16xf32>, vector<16x4xf32>, vector<16x4xf32> -> vector<16x4xf32>
    %cst_6 = arith.constant 2.000000e+00 : f32
    %8 = vector.broadcast %cst_6 : f32 to vector<16x4xf32>
    %9 = arith.mulf %8, %7 : vector<16x4xf32>
    %10 = arith.subf %9, %2 : vector<16x4xf32>
    %11 = tpu.concatenate %1, %2, %6, %10 in 1 : vector<16x4xf32>, vector<16x4xf32>, vector<16x4xf32>, vector<16x4xf32> -> vector<16x16xf32>
    %c0_7 = arith.constant 0 : index
    %c0_8 = arith.constant 0 : index
    %12 = vector.load %arg2[%c0_7, %c0_8] : memref<16x64xf32, #tpu.memory_space<vmem>>, vector<16x64xf32>
    %cst_9 = arith.constant dense<0.000000e+00> : vector<16x64xf32>
    %13 = tpu.matmul %11, %12, %cst_9 {dimension_numbers = #tpu.dot_dimension_numbers<[1], [0], [0], [1], [0, 0, 1, 1], [], []>} : vector<16x16xf32>, vector<16x64xf32>, vector<16x64xf32> -> vector<16x64xf32>
    %c0_10 = arith.constant 0 : index
    %c0_11 = arith.constant 0 : index
    %14 = vector.load %arg3[%c0_10, %c0_11] : memref<1x64xf32, #tpu.memory_space<vmem>>, vector<1x64xf32>
    %15 = vector.broadcast %14 : vector<1x64xf32> to vector<16x64xf32>
    %16 = arith.addf %13, %15 : vector<16x64xf32>
    %17 = vector.extract_strided_slice %16 {offsets = [0, 0], sizes = [16, 32], strides = [1, 1]} : vector<16x64xf32> to vector<16x32xf32>
    %18 = arith.negf %17 : vector<16x32xf32>
    %19 = math.exp %18 : vector<16x32xf32>
    %cst_12 = arith.constant 1.000000e+00 : f32
    %20 = vector.broadcast %cst_12 : f32 to vector<16x32xf32>
    %21 = arith.addf %20, %19 : vector<16x32xf32>
    %22 = arith.divf %20, %21 : vector<16x32xf32>
    %23 = vector.extract_strided_slice %16 {offsets = [0, 32], sizes = [16, 32], strides = [1, 1]} : vector<16x64xf32> to vector<16x32xf32>
    %24 = math.tanh %23 : vector<16x32xf32>
    %cst_13 = arith.constant 1.000000e+00 : f32
    %25 = vector.broadcast %cst_13 : f32 to vector<16x32xf32>
    %26 = arith.subf %25, %22 : vector<16x32xf32>
    %27 = arith.mulf %26, %24 : vector<16x32xf32>
    %c0_14 = arith.constant 0 : index
    %c0_15 = arith.constant 0 : index
    %28 = vector.load %arg4[%c0_14, %c0_15] : memref<1x32xf32, #tpu.memory_space<vmem>>, vector<1x32xf32>
    %29 = vector.broadcast %28 : vector<1x32xf32> to vector<16x32xf32>
    %30 = arith.mulf %27, %29 : vector<16x32xf32>
    %cst_16 = arith.constant dense<0.000000e+00> : vector<16xf32>
    %31 = vector.multi_reduction <add>, %30, %cst_16 [1] : vector<16x32xf32> to vector<16xf32>
    %32 = vector.shape_cast %31 : vector<16xf32> to vector<16x1xf32>
    %c0_17 = arith.constant 0 : index
    %c0_18 = arith.constant 0 : index
    %33 = vector.load %arg5[%c0_17, %c0_18] : memref<1x1xf32, #tpu.memory_space<vmem>>, vector<1x1xf32>
    %34 = vector.broadcast %33 : vector<1x1xf32> to vector<16x1xf32>
    %35 = arith.addf %32, %34 : vector<16x1xf32>
    %c0_19 = arith.constant 0 : index
    %c0_20 = arith.constant 0 : index
    %36 = vector.load %arg6[%c0_19, %c0_20] : memref<16x1xf32, #tpu.memory_space<vmem>>, vector<16x1xf32>
    tpu.vector_store %arg6[%c0_19, %c0_20], %35 {strides = array<i32>} : memref<16x1xf32, #tpu.memory_space<vmem>>, vector<16x1xf32>,
    return
  }
}

</mosaic_0001>

<bundles_post_ra>
// kernel: ourgru_forward.1
= control target key start
LH: loop header
LB: loop body
LE: loop exit
PB: predicated region body
PF: predicated region fallthrough
CT: control target
= control target key end

     0   :  { %s671_s0 = inlined_call_operand.hbm [shape: f32[16,16], index: 0, kind: input, shape index: {}]   ;;  %s672_s1 = inlined_call_operand.vmem [shape: f32[16,4], index: 1, kind: input, shape index: {}]   ;;  %s673_s2 = inlined_call_operand.vmem [shape: f32[16,64], index: 2, kind: input, shape index: {}]   ;;  %s674_s3 = inlined_call_operand.vmem [shape: f32[1,64], index: 3, kind: input, shape index: {}]   ;;  %s675_s4 = inlined_call_operand.vmem [shape: f32[1,32], index: 4, kind: input, shape index: {}]   ;;  %s676_s5 = inlined_call_operand.<no memory space> [shape: f32[1,1], index: 5, kind: input, shape index: {}]   ;;  %s677_s6 = inlined_call_operand.vmem [shape: f32[16,1], index: 6, kind: output, shape index: {}]  }
   0x1   :  { %v11_v0 = vstv %s676_s5 }
   0x2   :  { %12 = vst [vmem:[#allocation2] sm:$0x1] %v11_v0 }
   0x3   :  { %13 = vsyncpa [#allocation4], 0  ;;  %s580_s23 = smov [#allocation3]   ;;  %s556_s27 = scalar_lea.hbm %s671_s0, 256 }
   0x4   :  { %s19_s24 = sshll.u32 %s580_s23, 4  ;;  %p557_p0 = scmp.ne.s32.totalorder %s671_s0, %s556_s27  ;;  %s20_s24 = int_to_ptr.vmem [resolvable:$true] %s19_s24 }
   0x5   :  { %p560_p1 = scmp.lt.u32.totalorder %s556_s27, %s671_s0 }
   0x7   :  { %p562_p2 = pnand %p560_p1, %p557_p0 }
   0x9   :  { %565 = shalt.err (!%p562_p2)
}
   0xa   :  { %s566_s5 = scalar_lea.vmem %s20_s24, 256  ;;  %p571_p4 = scmp.lt.s32.totalorder %s20_s24, %s20_s24 }
   0xb   :  { %p567_p3 = scmp.ne.s32.totalorder %s20_s24, %s566_s5  ;;  %p572_p5 = scmp.lt.s32.totalorder %s566_s5, %s566_s5 }
   0xd   :  { %p573_p6 = por %p572_p5, %p571_p4 }
   0xf   :  { %p574_p7 = pnand %p573_p6, %p567_p3 }
  0x11   :  { %577 = shalt.err (!%p574_p7)
}
  0x12   :  { %s581_s8 = smov 128   ;;  %s582_s9 = smov 8  }
  0x13   :  { %25 = dma.hbm_to_vmem [thread:$0]  %s671_s0, 256, %s20_s24, [#allocation4], %s581_s8, %s581_s8, %s582_s9  }
  0x14   :  { %578 = dma.done.wait [#allocation4], 256  }
  0x15   :  { %579 = vsyncadd [#allocation4], 4294967040  ;;  %vm43_vm0 = vcmask 130048   ;;  %v41_v1 = vld [vmem:[%s672_s1] sm:$0xff]  ;;  %v42_v2 = vld [vmem:[%s672_s1 + $0x8] sm:$0xff]  ;;  %s583_s0 = smov 4  }
  0x16   :  { %v39_v3 = vld [vmem:[#allocation3] sm:$0xff]  ;;  %v522_v4 = vpack.c.bf16 %v42_v2, %v41_v1  ;;  %v40_v5 = vld [vmem:[#allocation3 + $0x8] sm:$0xff]  ;;  %s584_s19 = smov 12   ;;  %vm307_vm1 = vcmask 31744   ;;  %vm310_vm2 = vcmask 64512   ;;  %vm313_vm3 = vcmask 97280  }
  0x17   :  { %498 = vmatprep.mubr.msk.f32.mxu0 %vm43_vm0, %v39_v3  ;;  %505 = vmatprep.mubr.msk.f32.mxu1 %vm43_vm0, %v39_v3  ;;  %v316_v16 = vld [vmem:[%s673_s2] sm:$0xff]  ;;  %v317_v17 = vld [vmem:[%s673_s2 + $0x8] sm:$0xff]  ;;  %s585_s21 = smov 96   ;;  %vm441_vm4 = vcmask 261120   ;;  %vm457_vm5 = vcmask 7168  }
  0x18   :  { %523 = vmatprep.subr.bf16.mxu0 %v522_v4  ;;  %v534_v18 = vpack.c.bf16 %v317_v17, %v316_v16  ;;  %v471_v37 = vld [vmem:[%s674_s3] ss:$0 sm:$0xff] }
  0x19   :  { %525 = vmatpush3.bf16.msra.mxu0 %v522_v4  ;;  %v476_v55 = vld [vmem:[%s675_s4] ss:$0 sm:$0xff] }
  0x1a   :  { %v477_v63 = vld [vmem:[#allocation2] ss:$0 sm:$0xff] }
  0x1c   :  { %499 = vmatmul.mubr.msk.f32.vlgmr.msra.gmra.mrb[0].mxu0 %vm43_vm0, %v40_v5 }
  0x1d   :  { %512 = vmatprep.mubr.msk.f32.mxu0 %vm43_vm0, %v39_v3 }
  0xef   :  { %v500_v6 = vpop.f32.mrb[0].mxu0 }
  0xf0   :  { %287 = vrot.lane.b32.xlu0 %v500_v6, %s583_s0  ;;  %v116_v7 = vpop.f32.mrb[1].mxu0 }
  0xf1   :  { %v526_v8 = vpack.c.bf16 %v500_v6, %v116_v7 }
  0xf3   :  { %527 = vmatprep.subr.bf16.mxu1 %v526_v8 }
  0xf4   :  { %285 = vrot.lane.b32.xlu0 %v116_v7, %s583_s0  ;;  %529 = vmatpush3.bf16.msra.mxu1 %v526_v8 }
  0xf5   :  { %535 = vmatprep.subr.bf16.mxu1 %v534_v18 }
  0xf7   :  { %506 = vmatmul.mubr.msk.f32.vlgmr.msra.gmra.mrb[0].mxu1 %vm43_vm0, %v40_v5 }
  0xf8   :  { %537 = vmatpush3.bf16.msra.mxu1 %v534_v18 }
 0x162   :  { %v288_v26 = vpop.permute.xlu0 %287 }
 0x163   :  { %v309_v31 = vsel %vm307_vm1, %v42_v2, %v288_v26 }
 0x166   :  { %v286_v28 = vpop.permute.xlu0 %285 }
 0x167   :  { %v308_v29 = vsel %vm307_vm1, %v41_v1, %v286_v28 }
 0x1ca   :  { %v507_v9 = vpop.f32.mrb[0].mxu1 }
 0x1cb   :  { %v201_v10 = vmul.f32 2.0, %v507_v9  ;;  %v191_v11 = vpop.f32.mrb[1].mxu1 }
 0x1cc   :  { %v200_v12 = vmul.f32 2.0, %v191_v11 }
 0x1cd   :  { %v203_v13 = vsub.f32 %v201_v10, %v42_v2 }
 0x1ce   :  { %v202_v14 = vsub.f32 %v200_v12, %v41_v1 }
 0x1cf   :  { %295 = vrot.lane.b32.xlu1 %v203_v13, %s582_s9 }
 0x1d0   :  { %v530_v15 = vpack.c.bf16 %v203_v13, %v202_v14 }
 0x1d2   :  { %531 = vmatprep.subr.bf16.mxu0 %v530_v15 }
 0x1d3   :  { %293 = vrot.lane.b32.xlu1 %v202_v14, %s582_s9  ;;  %533 = vmatpush3.bf16.msra.mxu0 %v530_v15 }
 0x1d6   :  { %513 = vmatmul.mubr.msk.f32.vlgmr.msra.gmra.mrb[2].mxu0 %vm43_vm0, %v40_v5 }
 0x241   :  { %v296_v25 = vpop.permute.xlu1 %295 }
 0x242   :  { %v312_v34 = vsel %vm310_vm2, %v309_v31, %v296_v25 }
 0x245   :  { %v294_v27 = vpop.permute.xlu1 %293 }
 0x246   :  { %v311_v32 = vsel %vm310_vm2, %v308_v29, %v294_v27 }
 0x2a9   :  { %v514_v19 = vpop.f32.mrb[2].mxu0 }
 0x2aa   :  { %v280_v20 = vmul.f32 2.0, %v514_v19  ;;  %v270_v21 = vpop.f32.mrb[3].mxu0 }
 0x2ab   :  { %v279_v22 = vmul.f32 2.0, %v270_v21 }
 0x2ac   :  { %v282_v23 = vsub.f32 %v280_v20, %v500_v6 }
 0x2ad   :  { %v281_v24 = vsub.f32 %v279_v22, %v116_v7 }
 0x2ae   :  { %303 = vrot.lane.b32.xlu1 %v282_v23, %s584_s19 }
 0x2af   :  { %301 = vrot.lane.b32.xlu0 %v281_v24, %s584_s19 }
 0x320   :  { %v304_v30 = vpop.permute.xlu1 %303 }
 0x321   :  { %v302_v33 = vpop.permute.xlu0 %301  ;;  %v315_v36 = vsel %vm313_vm3, %v312_v34, %v304_v30 }
 0x322   :  { %v314_v35 = vsel %vm313_vm3, %v311_v32, %v302_v33 }
 0x323   :  { %519 = vmatprep.mubr.msk.f32.mxu1 %vm43_vm0, %v314_v35 }
 0x324   :  { %520 = vmatmul.mubr.msk.f32.vlgmr.msra.gmra.mrb[2].mxu1 %vm43_vm0, %v315_v36 }
 0x3f7   :  { %v521_v38 = vpop.f32.mrb[2].mxu1 }
 0x3f8   :  { %v403_v39 = vadd.f32 %v521_v38, %v471_v37  ;;  %v397_v40 = vpop.f32.mrb[3].mxu1 }
 0x3f9   :  { %v398_v41 = vadd.f32 %v471_v37, %v397_v40 }
 0x3fa   :  { %544 = vtanh.f32 %v403_v39  ;;  %v475_v44 = vmul.f32 -1.442695, %v403_v39 }
 0x3fb   :  { %546 = vtanh.f32 %v398_v41  ;;  %v474_v45 = vmul.f32 -1.442695, %v398_v41 }
 0x3fc   :  { %548 = vpow2.f32 %v475_v44 }
 0x3fd   :  { %550 = vpow2.f32 %v474_v45 }
 0x404   :  { %v545_v42 = vpop.eup %544 }
 0x405   :  { %v547_v43 = vpop.eup %546  ;;  %426 = vrot.lane.b32.xlu1 %v545_v42, %s585_s21 }
 0x406   :  { %424 = vrot.lane.b32.xlu0 %v547_v43, %s585_s21  ;;  %v549_v46 = vpop.eup %548 }
 0x407   :  { %v551_v47 = vpop.eup %550  ;;  %v413_v48 = vadd.f32 1.0, %v549_v46 }
 0x408   :  { %v412_v49 = vadd.f32 1.0, %v551_v47 }
 0x409   :  { %552 = vrcp.f32 %v413_v48 }
 0x40a   :  { %554 = vrcp.f32 %v412_v49 }
 0x413   :  { %v553_v50 = vpop.eup %552 }
 0x414   :  { %v555_v51 = vpop.eup %554  ;;  %v421_v52 = vsub.f32 1.0, %v553_v50 }
 0x415   :  { %v420_v54 = vsub.f32 1.0, %v555_v51 }
 0x477   :  { %v427_v53 = vpop.permute.xlu1 %426 }
 0x478   :  { %v431_v56 = vmul.f32 %v427_v53, %v421_v52  ;;  %v425_v57 = vpop.permute.xlu0 %424 }
 0x479   :  { %v430_v58 = vmul.f32 %v425_v57, %v420_v54 }
 0x47a   :  { %v440_v59 = vmul.f32 %v476_v55, %v431_v56 }
 0x47b   :  { %v439_v60 = vmul.f32 %v476_v55, %v430_v58 }
 0x47c   :  { %v445_v61 = vsel %vm441_vm4, %v440_v59, 0.0 }
 0x47d   :  { %446 = vadd.xlane.f32.xlu1 %v445_v61  ;;  %v442_v62 = vsel %vm441_vm4, %v439_v60, 0.0 }
 0x47e   :  { %443 = vadd.xlane.f32.xlu0 %v442_v62 }
 0x50a   :  { %v447_v0 = vpop.xlane.xlu1 %446 }
 0x50b   :  { %v456_v1 = vadd.f32 %v477_v63, %v447_v0  ;;  %v444_v2 = vpop.xlane.xlu0 %443 }
 0x50c   :  { %v455_v3 = vadd.f32 %v477_v63, %v444_v2 }
 0x50d   :  { %459 = vst.msk [vmem:[%s677_s6 + $0x8] sm:$0xff] %vm457_vm5, %v456_v1 }
 0x50e   :  { %458 = vst.msk [vmem:[%s677_s6] sm:$0xff] %vm457_vm5, %v455_v3 }
 0x50f   :  { %464 = vsyncpa [#allocation4], 1 }

</bundles_post_ra>
